<compile_context>
chip_gen: v5e
topology: v5e:2x2
jax: 0.10.0
libtpu: 0.0.40
codegen_flags: <defaults>
</compile_context>

<pallas_src>
import jax
import jax.numpy as jnp
from jax.experimental import pallas as pl
from jax.experimental.pallas import tpu as pltpu


def _copy_kernel(x_ref, o_ref):
    # Straight elementwise copy of the current (tr, cols) tile.
    o_ref[...] = x_ref[...]


def _copy_2d_pallas(x2d, max_tile_rows=None):
    """Identity copy of a 2D array through a tiled, pipelined Pallas kernel."""
    rows, cols = x2d.shape
    itemsize = x2d.dtype.itemsize
    # Sublane packing: second-to-last block dim multiple of 8 (f32),
    # 16 (bf16/f16), 32 (int8/fp8) -- or the full dim.
    sub = 8 * max(1, 4 // itemsize)

    # ~4 MiB per tile buffer; with in+out each double-buffered that is
    # <= 16 MiB of VMEM, safe on v5e/v6e/v7x.
    tile_budget_bytes = 4 * 1024 * 1024
    max_tr = max(1, tile_budget_bytes // max(1, cols * itemsize))
    if max_tile_rows is not None:
        max_tr = min(max_tr, max_tile_rows)

    tr = min(rows, max_tr)
    if tr < rows:
        # Keep the tile sublane-aligned when it is not the full row extent.
        tr = max(sub, (tr // sub) * sub)
        tr = min(tr, rows)

    grid = (pl.cdiv(rows, tr),)
    spec = pl.BlockSpec((tr, cols), lambda i: (i, 0))

    return pl.pallas_call(
        _copy_kernel,
        out_shape=jax.ShapeDtypeStruct((rows, cols), x2d.dtype),
        grid=grid,
        in_specs=[spec],
        out_specs=spec,
        compiler_params=pltpu.CompilerParams(
            dimension_semantics=("parallel",),
            vmem_limit_bytes=32 * 1024 * 1024,
        ),
        cost_estimate=pl.CostEstimate(
            flops=0,
            transcendentals=0,
            bytes_accessed=2 * rows * cols * itemsize,
        ),
    )(x2d)


def squeeze_pallas(x, dim, *, _max_tile_rows=None):
    """Pallas implementation of torch.Tensor.squeeze(dim)."""
    ndim = x.ndim
    # Normalize negative dims (PyTorch convention).
    if dim < 0:
        dim += ndim

    # PyTorch semantics: squeezing a dim whose size != 1 is a no-op.
    if x.shape[dim] != 1:
        return x

    out_shape = tuple(s for i, s in enumerate(x.shape) if i != dim)
    n = x.size
    if n == 0:
        # Empty tensor: pure metadata change.
        return x.reshape(out_shape)

    # Flatten to a lane-dense 2D view [rows, cols]: cols is the largest
    # multiple-of-128 divisor of n (capped), otherwise fall back to cols = n.
    if n % 128 == 0:
        cols = 128
        while cols * 2 <= 4096 and n % (cols * 2) == 0:
            cols *= 2
    else:
        cols = n
    rows = n // cols

    # The reshape is metadata-only (contiguous layout); the Pallas kernel does
    # the single pipelined HBM round trip on the lane-dense slab.
    x2d = x.reshape(rows, cols)
    y2d = _copy_2d_pallas(x2d, max_tile_rows=_max_tile_rows)
    return y2d.reshape(out_shape)


if __name__ == "__main__":
    key = jax.random.PRNGKey(0)

    # Small NCHW input with a size-1 channel dim; Squeeze(dim=1).
    x = jax.random.normal(key, (2, 1, 16, 16), dtype=jnp.float32)
    y = squeeze_pallas(x, 1)
    y = jax.block_until_ready(y)
    ref = jnp.squeeze(x, axis=1)
    assert y.shape == (2, 16, 16), y.shape
    assert y.dtype == x.dtype
    assert jnp.array_equal(y, ref)

    # Slightly larger case that exercises the multi-step (grid > 1) tiled path.
    x2 = jax.random.normal(jax.random.PRNGKey(0), (2, 1, 128, 512),
                           dtype=jnp.float32)
    y2 = jax.block_until_ready(squeeze_pallas(x2, 1, _max_tile_rows=8))
    assert y2.shape == (2, 128, 512)
    assert jnp.array_equal(y2, jnp.squeeze(x2, axis=1))

    # Negative dim.
    x3 = jax.random.normal(jax.random.PRNGKey(0), (2, 16, 16, 1),
                           dtype=jnp.float32)
    y3 = jax.block_until_ready(squeeze_pallas(x3, -1))
    assert y3.shape == (2, 16, 16)
    assert jnp.array_equal(y3, jnp.squeeze(x3, axis=-1))

    # No-op case (dim size != 1): PyTorch returns the tensor unchanged.
    y4 = jax.block_until_ready(squeeze_pallas(x, 0))
    assert y4.shape == x.shape
    assert jnp.array_equal(y4, x)

    print("KERNEL_OK")
</pallas_src>

<mosaic_0001>
module attributes {stable_mosaic.version = 11 : i64} {
  func.func @_copy_kernel(%arg0: i32, %arg1: memref<1x512xf32, #tpu.memory_space<vmem>>, %arg2: memref<1x512xf32, #tpu.memory_space<vmem>>) attributes {dimension_semantics = [#tpu.dimension_semantics<parallel>], iteration_bounds = array<i64: 1>, scalar_prefetch = 0 : i64, scratch_operands = 0 : i64, tpu.core_type = #tpu.core_type<tc>, window_params = [{transform_indices = @transform_0, window_bounds = array<i64: 1, 512>}, {transform_indices = @transform_1, window_bounds = array<i64: 1, 512>}]} {
    %c0 = arith.constant 0 : index
    %c0_0 = arith.constant 0 : index
    %0 = vector.load %arg1[%c0, %c0_0] : memref<1x512xf32, #tpu.memory_space<vmem>>, vector<1x512xf32>
    %c0_1 = arith.constant 0 : index
    %c0_2 = arith.constant 0 : index
    %1 = vector.load %arg2[%c0_1, %c0_2] : memref<1x512xf32, #tpu.memory_space<vmem>>, vector<1x512xf32>
    tpu.vector_store %arg2[%c0_1, %c0_2], %0 {strides = array<i32>} : memref<1x512xf32, #tpu.memory_space<vmem>>, vector<1x512xf32>,
    return
  }
  func.func @transform_0(%arg0: i32) -> (i32, i32) {
    %c0_i32 = arith.constant 0 : i32
    %c0_i32_0 = arith.constant 0 : i32
    return %arg0, %c0_i32 : i32, i32
  }
  func.func @transform_1(%arg0: i32) -> (i32, i32) {
    %c0_i32 = arith.constant 0 : i32
    %c0_i32_0 = arith.constant 0 : i32
    return %arg0, %c0_i32 : i32, i32
  }
}

</mosaic_0001>

<bundles_post_ra>
// kernel: tpu_custom_call.1
= control target key start
LH: loop header
LB: loop body
LE: loop exit
PB: predicated region body
PF: predicated region fallthrough
CT: control target
= control target key end

     0   :  { %6 = vsyncpa [#allocation3], 0  ;;  %s118_s0 = inlined_call_operand.hbm [shape: f32[1,512], index: 0, kind: input, shape index: {}]   ;;  %s119_s1 = inlined_call_operand.hbm [shape: f32[1,512], index: 1, kind: output, shape index: {}]  }
   0x1   :  { %7 = vsyncpa [#allocation4], 0  ;;  %s13_s8 = sshll.u32 %s118_s0, 4  ;;  %s100_s9 = smov [#allocation2]   ;;  %s14_s8 = int_to_ptr.hbm [resolvable:$true] %s13_s8 }
   0x2   :  { %s15_s10 = sshll.u32 %s100_s9, 4  ;;  %s16_s10 = int_to_ptr.vmem [resolvable:$true] %s15_s10 }
   0x3   :  { %18 = dma.hbm_to_vmem [thread:$0]  %s14_s8, 64, %s16_s10, [#allocation3]  }
   0x4   :  { %96 = dma.done.wait [#allocation3], 64  }
   0x5   :  { %97 = vsyncadd [#allocation3], 4294967232  ;;  %v24_v0 = vlaneseq  ;;  %s101_s11 = smov [#allocation5]   ;;  %s36_s15 = sshll.u32 %s119_s1, 4  ;;  %v23_v1 = vld [vmem:[#allocation2] sm:$0xf]  ;;  %s37_s15 = int_to_ptr.hbm [resolvable:$true] %s36_s15 }
   0x6   :  { %s34_s12 = sshll.u32 %s101_s11, 4  ;;  %s35_s12 = int_to_ptr.vmem [resolvable:$true] %s34_s12 }
   0x7   :  { %vm26_vm0 = vcmp.lt.s32.totalorder %v24_v0, 512 }
   0x8   :  { %28 = vst.msk [vmem:[#allocation5] sm:$0xf] %vm26_vm0, %v23_v1 }
   0x9   :  { %39 = dma.vmem_to_hbm [thread:$0]  %s35_s12, 64, %s37_s15, [#allocation4]  }
   0xa   :  { %98 = dma.done.wait [#allocation4], 64  }
   0xb   :  { %99 = vsyncadd [#allocation4], 4294967232 }
   0xc   :  { %44 = vsyncpa [#allocation3], 1 }
   0xd   :  { %45 = vsyncpa [#allocation4], 1 }

</bundles_post_ra>
